<compile_context>
chip_gen: v7x
topology: tpu7x:2x2x1
jax: 0.10.0
libtpu: 0.0.40
codegen_flags: <defaults>
</compile_context>

<pallas_src>
import functools

import jax
import jax.numpy as jnp
from jax import lax
from jax.experimental import pallas as pl
from jax.experimental.pallas import tpu as pltpu


# ----------------------------------------------------------------------------
# Small helpers
# ----------------------------------------------------------------------------

def _inv_pow(t, beta):
    """t ** (-beta) without jnp.power (t = 1 + alpha*avg(x^2) > 0, alpha >= 0)."""
    if beta == 0.75:
        return lax.rsqrt(t * jnp.sqrt(t))        # t^-0.75 = rsqrt(t * sqrt(t))
    if beta == 0.5:
        return lax.rsqrt(t)
    if beta == 0.25:
        return lax.rsqrt(jnp.sqrt(t))
    if beta == 1.0:
        return pl.reciprocal(t, approx=False)     # EUP reciprocal, no divide chain
    return jnp.exp(-beta * jnp.log(t))


def _vmem_capacity_bytes():
    """Per-core VMEM capacity; conservative fallback if the query fails."""
    try:
        return int(pltpu.get_tpu_info().vmem_capacity_bytes)
    except Exception:
        return 64 * 1024 * 1024        # v7x per-TensorCore VMEM (smallest current)


def _vmem_limit(need_bytes, cap_bytes):
    hi = max(cap_bytes * 3 // 4, 16 * 1024 * 1024)
    return int(min(max(2 * need_bytes, 32 * 1024 * 1024), hi))


def _row_block(m, row_bytes, target_bytes):
    """Row-block size and grid length for an (m, L) lane-dense view.

    Prefers exact divisors of m that are multiples of 8; falls back to a
    pl.cdiv grid with a partial trailing block so tile size never degenerates
    because of m's factorization."""
    if m < 8 or m * row_bytes <= target_bytes:
        return m, 1
    max_rows = max(target_bytes // row_bytes, 1)
    best = 0
    for d in range(8, min(m, max_rows) + 1, 8):
        if m % d == 0:
            best = d
    if best:
        return best, m // best
    rb = max(8, (max_rows // 8) * 8)
    return rb, pl.cdiv(m, rb)


def _pick_lane_block(hw, rows, elem, n_outer, target_bytes):
    """Largest 128-aligned divisor of hw whose (rows, blk) tile fits the
    budget, preferring >= 4 total grid steps (megacore).  Falls back to hw
    itself (full trailing dim is always layout-legal)."""
    cands = [d for d in range(128, hw + 1, 128) if hw % d == 0]
    if not cands:
        return hw
    fitting = [d for d in cands if rows * d * elem <= target_bytes]
    if not fitting:
        return cands[0]
    blk = max(fitting)
    if n_outer * (hw // blk) < 4:
        smaller = [d for d in fitting if n_outer * (hw // d) >= 4]
        if smaller:
            blk = max(smaller)
    return blk


def _pick_channel_block(c, hw, elem, n_outer, target_bytes):
    """Divisor of c that is sublane-legal (multiple of 8, or c itself), fits
    the budget, and keeps >= 4 total grid steps when possible."""
    cands = sorted(set([d for d in range(8, c + 1, 8) if c % d == 0] + [c]))
    fitting = [d for d in cands if d * hw * elem <= target_bytes]
    if not fitting:
        return min(cands)
    blk = max(fitting)
    if n_outer * (c // blk) < 4:
        smaller = [d for d in fitting if n_outer * (c // d) >= 4]
        if smaller:
            blk = max(smaller)
    return blk


# ----------------------------------------------------------------------------
# Kernels
# ----------------------------------------------------------------------------

def _lrn_pointwise_kernel(x_ref, o_ref, *, alpha, beta):
    # local_size == 1: a 1-wide average pool is the identity -> elementwise.
    x = x_ref[...].astype(jnp.float32)
    t = x * x * alpha + 1.0
    o_ref[...] = (x * _inv_pow(t, beta)).astype(o_ref.dtype)


def _lrn_within_kernel(wpos_ref, x_ref, o_ref, *, local_size, alpha, beta, width):
    # Block: (1, C_blk, H*W), lane-dense.  Separable spatial pooling via
    # lane-axis rolls (XLU) + boundary masks: no scratch buffers, no masked
    # scratch stores, no lane-unaligned slices.  wpos_ref carries the
    # w-coordinate of every flattened position (precomputed in the wrapper).
    x = x_ref[0].astype(jnp.float32)                 # (C_blk, HW)
    hw = x.shape[1]
    pad = (local_size - 1) // 2
    x2 = x * x

    w = jnp.broadcast_to(wpos_ref[...], x2.shape)    # hoisted mask source
    flat = lax.broadcasted_iota(jnp.int32, x2.shape, 1)

    # W pass: neighbours within a row.  roll(x2, hw - e) puts x2[p + e] at p;
    # wrap-around / row-crossing terms are masked with the w-coordinate.
    row = x2
    for e in range(1, pad + 1):
        if e < width:
            row = row + jnp.where(w >= e, pltpu.roll(x2, shift=e, axis=1), 0.0)
            row = row + jnp.where(w < width - e,
                                  pltpu.roll(x2, shift=hw - e, axis=1), 0.0)

    # H pass: neighbours across rows = shifts by multiples of `width` in the
    # flat layout (cannot cross rows), masked at the top/bottom edges.
    acc = row
    for d in range(1, pad + 1):
        s = d * width
        if s < hw:
            acc = acc + jnp.where(flat >= s, pltpu.roll(row, shift=s, axis=1), 0.0)
            acc = acc + jnp.where(flat < hw - s,
                                  pltpu.roll(row, shift=hw - s, axis=1), 0.0)

    t = acc * (alpha / float(local_size * local_size)) + 1.0
    o_ref[0] = (x * _inv_pow(t, beta)).astype(o_ref.dtype)


def _lrn_across_kernel(x_ref, o_ref, pc_ref, *, local_size, alpha, beta):
    # Block: (1, C, hw_blk), lane-dense.  Channel pooling via a zero-padded
    # scratch; only the pad slabs are zeroed (interior written exactly once),
    # then summed with static sublane-offset slices.
    x = x_ref[0].astype(jnp.float32)                 # (C, hw_blk)
    C, hwb = x.shape
    pad = (local_size - 1) // 2

    pc_ref[0:pad, :] = jnp.zeros((pad, hwb), jnp.float32)
    pc_ref[pad + C:pad + C + pad, :] = jnp.zeros((pad, hwb), jnp.float32)
    pc_ref[pad:pad + C, :] = x * x

    acc = pc_ref[0:C, :]
    for d in range(1, local_size):
        acc = acc + pc_ref[d:d + C, :]

    t = acc * (alpha / float(local_size)) + 1.0
    o_ref[0] = (x * _inv_pow(t, beta)).astype(o_ref.dtype)


# ----------------------------------------------------------------------------
# Wrapper
# ----------------------------------------------------------------------------

def lrn(x, local_size=1, alpha=1.0, beta=0.75, across_channels=False):
    """Pallas forward pass of the LRN module.  x: (N, C, H, W); alpha >= 0."""
    N, C, H, W = x.shape
    assert local_size % 2 == 1, "shape-preserving LRN assumes odd local_size"
    elem = x.dtype.itemsize
    vmem_cap = _vmem_capacity_bytes()

    if local_size == 1:
        # 1-wide average pooling is the identity -> purely elementwise.
        # Reshape by total element count to a fixed lane-dense width so stores
        # stay wide and unmasked even when H*W is not a multiple of 128.
        total = N * C * H * W
        lane = next((l for l in (1024, 512, 256, 128) if total % l == 0), None)
        if lane is None:
            m, lane = N * C, H * W            # fallback: full-trailing-dim layout
        else:
            m = total // lane
        x2d = x.reshape(m, lane)
        target = min(4 * 1024 * 1024, max(vmem_cap // 32, 512 * 1024))
        rb, steps = _row_block(m, lane * elem, target)
        need = 4 * rb * lane * (elem + 4)
        kernel = functools.partial(_lrn_pointwise_kernel, alpha=alpha, beta=beta)
        out2d = pl.pallas_call(
            kernel,
            out_shape=jax.ShapeDtypeStruct((m, lane), x.dtype),
            grid_spec=pltpu.PrefetchScalarGridSpec(
                num_scalar_prefetch=0,
                grid=(steps,),
                in_specs=[pl.BlockSpec((rb, lane), lambda i: (i, 0))],
                out_specs=pl.BlockSpec((rb, lane), lambda i: (i, 0)),
            ),
            compiler_params=pltpu.CompilerParams(
                dimension_semantics=("parallel",),
                vmem_limit_bytes=_vmem_limit(need, vmem_cap)),
        )(x2d)
        return out2d.reshape(N, C, H, W)

    pad = (local_size - 1) // 2
    HW = H * W
    x3 = x.reshape(N, C, HW)                  # lane-dense spatial view (free reshape)
    # ~1 MiB tiles on v7x (64 MiB VMEM), ~2 MiB on v5e/v6e (128 MiB).
    target = min(2 * 1024 * 1024, max(vmem_cap // 64, 256 * 1024))

    if across_channels:
        # TODO(synk): consider pipeline_mode=pl.Buffered(3) on the input spec if
        # profiling shows exposed DMA from the C strided sub-transfers per tile.
        hw_blk = _pick_lane_block(HW, C, elem, N, target)
        grid = (N, HW // hw_blk)
        spec = pl.BlockSpec((1, C, hw_blk), lambda n, j: (n, 0, j))
        kernel = functools.partial(_lrn_across_kernel, local_size=local_size,
                                   alpha=alpha, beta=beta)
        scratch = [pltpu.VMEM((C + 2 * pad, hw_blk), jnp.float32)]
        in_specs = [spec]
        operands = (x3,)
        need = 4 * C * hw_blk * elem + (C + 2 * pad + 6 * C) * hw_blk * 4
    else:
        cb = _pick_channel_block(C, HW, elem, N, target)
        grid = (N, C // cb)
        spec = pl.BlockSpec((1, cb, HW), lambda n, c: (n, c, 0))
        kernel = functools.partial(_lrn_within_kernel, local_size=local_size,
                                   alpha=alpha, beta=beta, width=W)
        scratch = []
        # w-coordinate of every flattened spatial position (row-boundary masks).
        wpos = jnp.broadcast_to(jnp.arange(W, dtype=jnp.int32)[None, :],
                                (H, W)).reshape(1, HW)
        in_specs = [pl.BlockSpec((1, HW), lambda n, c: (0, 0)), spec]
        operands = (wpos, x3)
        need = 4 * cb * HW * elem + 8 * cb * HW * 4 + 4 * HW * 4

    out3 = pl.pallas_call(
        kernel,
        out_shape=jax.ShapeDtypeStruct((N, C, HW), x.dtype),
        grid_spec=pltpu.PrefetchScalarGridSpec(
            num_scalar_prefetch=0,
            grid=grid,
            in_specs=in_specs,
            out_specs=spec,
            scratch_shapes=scratch,
        ),
        compiler_params=pltpu.CompilerParams(
            dimension_semantics=("parallel", "parallel"),
            vmem_limit_bytes=_vmem_limit(need, vmem_cap)),
    )(*operands)
    return out3.reshape(N, C, H, W)


# ----------------------------------------------------------------------------
# Pure-JAX reference (mirrors the PyTorch module, count_include_pad=True)
# ----------------------------------------------------------------------------

def _lrn_reference(x, local_size=1, alpha=1.0, beta=0.75, across_channels=False):
    x = x.astype(jnp.float32)
    x2 = x * x
    pad = (local_size - 1) // 2
    if across_channels:
        x2p = jnp.pad(x2, ((0, 0), (pad, pad), (0, 0), (0, 0)))
        acc = jnp.zeros_like(x2)
        for m in range(local_size):
            acc = acc + x2p[:, m:m + x.shape[1], :, :]
        avg = acc / local_size
    else:
        x2p = jnp.pad(x2, ((0, 0), (0, 0), (pad, pad), (pad, pad)))
        acc = jnp.zeros_like(x2)
        for m in range(local_size):
            for n in range(local_size):
                acc = acc + x2p[:, :, m:m + x.shape[2], n:n + x.shape[3]]
        avg = acc / (local_size * local_size)
    div = jnp.power(avg * alpha + 1.0, beta)
    return x / div


if __name__ == "__main__":
    key = jax.random.PRNGKey(0)
    x = jax.random.normal(key, (2, 4, 16, 16), dtype=jnp.float32)

    # Default module config: local_size=1, alpha=1.0, beta=0.75, within-channel.
    out = jax.block_until_ready(lrn(x, 1, 1.0, 0.75, False))
    ref = _lrn_reference(x, 1, 1.0, 0.75, False)
    assert jnp.allclose(out, ref, atol=1e-4, rtol=1e-4)

    # Non-trivial spatial pooling windows, within-channel mode.
    out = jax.block_until_ready(lrn(x, 3, 1.0, 0.75, False))
    ref = _lrn_reference(x, 3, 1.0, 0.75, False)
    assert jnp.allclose(out, ref, atol=1e-4, rtol=1e-4)

    out = jax.block_until_ready(lrn(x, 5, 2.0, 0.75, False))
    ref = _lrn_reference(x, 5, 2.0, 0.75, False)
    assert jnp.allclose(out, ref, atol=1e-4, rtol=1e-4)

    # ACROSS_CHANNELS=True mode.
    out = jax.block_until_ready(lrn(x, 3, 1.0, 0.75, True))
    ref = _lrn_reference(x, 3, 1.0, 0.75, True)
    assert jnp.allclose(out, ref, atol=1e-4, rtol=1e-4)

    print("KERNEL_OK")
</pallas_src>

<mosaic_0001>
module attributes {stable_mosaic.version = 11 : i64} {
  func.func @_lrn_pointwise_kernel(%arg0: i32, %arg1: memref<2x1024xf32, #tpu.memory_space<vmem>>, %arg2: memref<2x1024xf32, #tpu.memory_space<vmem>>) attributes {dimension_semantics = [#tpu.dimension_semantics<parallel>], iteration_bounds = array<i64: 1>, scalar_prefetch = 0 : i64, scratch_operands = 0 : i64, tpu.core_type = #tpu.core_type<tc>, window_params = [{transform_indices = @transform_0, window_bounds = array<i64: 2, 1024>}, {transform_indices = @transform_1, window_bounds = array<i64: 2, 1024>}]} {
    %c0 = arith.constant 0 : index
    %c0_0 = arith.constant 0 : index
    %0 = vector.load %arg1[%c0, %c0_0] : memref<2x1024xf32, #tpu.memory_space<vmem>>, vector<2x1024xf32>
    %1 = arith.mulf %0, %0 : vector<2x1024xf32>
    %cst = arith.constant 1.000000e+00 : f32
    %2 = vector.broadcast %cst : f32 to vector<2x1024xf32>
    %3 = arith.mulf %1, %2 : vector<2x1024xf32>
    %cst_1 = arith.constant 1.000000e+00 : f32
    %4 = vector.broadcast %cst_1 : f32 to vector<2x1024xf32>
    %5 = arith.addf %3, %4 : vector<2x1024xf32>
    %6 = math.sqrt %5 : vector<2x1024xf32>
    %7 = arith.mulf %5, %6 : vector<2x1024xf32>
    %8 = math.rsqrt %7 : vector<2x1024xf32>
    %9 = arith.mulf %0, %8 : vector<2x1024xf32>
    %c0_2 = arith.constant 0 : index
    %c0_3 = arith.constant 0 : index
    %10 = vector.load %arg2[%c0_2, %c0_3] : memref<2x1024xf32, #tpu.memory_space<vmem>>, vector<2x1024xf32>
    tpu.vector_store %arg2[%c0_2, %c0_3], %9 {strides = array<i32>} : memref<2x1024xf32, #tpu.memory_space<vmem>>, vector<2x1024xf32>,
    return
  }
  func.func @transform_0(%arg0: i32) -> (i32, i32) {
    %c0_i32 = arith.constant 0 : i32
    %c0_i32_0 = arith.constant 0 : i32
    return %arg0, %c0_i32 : i32, i32
  }
  func.func @transform_1(%arg0: i32) -> (i32, i32) {
    %c0_i32 = arith.constant 0 : i32
    %c0_i32_0 = arith.constant 0 : i32
    return %arg0, %c0_i32 : i32, i32
  }
}

</mosaic_0001>

<bundles_post_ra>
// kernel: tpu_custom_call.1
= control target key start
LH: loop header
LB: loop body
LE: loop exit
PB: predicated region body
PF: predicated region fallthrough
CT: control target
= control target key end

     0   :  { %6 = vsyncpa [#allocation3], 0  ;;  %s158_s0 = inlined_call_operand.hbm [shape: f32[2,1024], index: 0, kind: input, shape index: {}]   ;;  %s159_s1 = inlined_call_operand.hbm [shape: f32[2,1024], index: 1, kind: output, shape index: {}]  }
   0x1   :  { %7 = vsyncpa [#allocation4], 0  ;;  %s122_s6 = smov [#allocation2]   ;;  %s74_s10 = scalar_lea.hbm %s158_s0, 256 }
   0x2   :  { %s14_s7 = sshll.u32 %s122_s6, 4  ;;  %p75_p0 = scmp.ne.s32.totalorder %s158_s0, %s74_s10  ;;  %s15_s7 = int_to_ptr.vmem [resolvable:$true] %s14_s7 }
   0x3   :  { %p78_p1 = scmp.lt.u32.totalorder %s74_s10, %s158_s0 }
   0x5   :  { %p80_p2 = pnand %p78_p1, %p75_p0 }
   0x7   :  { %83 = shalt.err (!%p80_p2)
}
   0x8   :  { %s84_s15 = scalar_lea.vmem %s15_s7, 256  ;;  %p89_p4 = scmp.lt.s32.totalorder %s15_s7, %s15_s7 }
   0x9   :  { %p85_p3 = scmp.ne.s32.totalorder %s15_s7, %s84_s15  ;;  %p90_p5 = scmp.lt.s32.totalorder %s84_s15, %s84_s15 }
   0xb   :  { %p91_p6 = por %p90_p5, %p89_p4 }
   0xd   :  { %p92_p7 = pnand %p91_p6, %p85_p3 }
   0xf   :  { %95 = shalt.err (!%p92_p7)
}
  0x10   :  { %17 = dma.hbm_to_vmem [thread:$0]  %s158_s0, 256, %s15_s7, [#allocation3]  }
  0x11   :  { %118 = dma.done.wait [#allocation3], 256  }
  0x12   :  { %119 = vsyncadd [#allocation3], 4294967040  ;;  %v21_v0 = vld [vmem:[#allocation2] sm:$0xff]  ;;  %v22_v1 = vld [vmem:[#allocation2 + $0x8] sm:$0xff]  ;;  %s123_s0 = smov [#allocation5]  }
  0x13   :  { %v23_v2 = vmul.f32 %v21_v0, %v21_v0  ;;  %v24_v3 = vmul.f32 %v22_v1, %v22_v1  ;;  %s55_s18 = sshll.u32 %s123_s0, 4  ;;  %s56_s18 = int_to_ptr.vmem [resolvable:$true] %s55_s18 }
  0x14   :  { %s96_s19 = scalar_lea.vmem %s56_s18, 256  ;;  %p101_p9 = scmp.lt.s32.totalorder %s56_s18, %s56_s18 }
  0x15   :  { %v25_v4 = vadd.f32 1.0, %v23_v2  ;;  %v26_v5 = vadd.f32 1.0, %v24_v3  ;;  %p97_p8 = scmp.ne.s32.totalorder %s56_s18, %s96_s19  ;;  %p102_p10 = scmp.lt.s32.totalorder %s96_s19, %s96_s19 }
  0x17   :  { %66 = vrsqrt.f32 %v25_v4  ;;  %vm29_vm0 = vcmp.eq.f32.partialorder %v25_v4, inf  ;;  %v32_v7 = vand.u32 2147483648, %v25_v4  ;;  %vm31_vm1 = vcmp.eq.f32.partialorder %v25_v4, 0.0  ;;  %p103_p11 = por %p102_p10, %p101_p9 }
  0x18   :  { %68 = vrsqrt.f32 %v26_v5  ;;  %vm36_vm2 = vcmp.eq.f32.partialorder %v26_v5, inf  ;;  %v39_v10 = vand.u32 2147483648, %v26_v5  ;;  %vm38_vm3 = vcmp.eq.f32.partialorder %v26_v5, 0.0 }
  0x19   :  { %p104_p12 = pnand %p103_p11, %p97_p8 }
  0x21   :  { %v67_v6 = vpop.eup %66 }
  0x22   :  { %v69_v8 = vpop.eup %68  ;;  %v28_v9 = vmul.f32 %v67_v6, %v25_v4 }
  0x23   :  { %v35_v11 = vmul.f32 %v69_v8, %v26_v5 }
  0x24   :  { %v30_v12 = vsel %vm29_vm0, %v25_v4, %v28_v9 }
  0x25   :  { %v33_v13 = vsel %vm31_vm1, %v32_v7, %v30_v12  ;;  %v37_v14 = vsel %vm36_vm2, %v26_v5, %v35_v11 }
  0x26   :  { %v41_v15 = vmul.f32 %v33_v13, %v25_v4  ;;  %v40_v16 = vsel %vm38_vm3, %v39_v10, %v37_v14 }
  0x27   :  { %v42_v17 = vmul.f32 %v40_v16, %v26_v5 }
  0x28   :  { %70 = vrsqrt.f32 %v41_v15 }
  0x29   :  { %72 = vrsqrt.f32 %v42_v17 }
  0x32   :  { %v71_v18 = vpop.eup %70 }
  0x33   :  { %v73_v19 = vpop.eup %72  ;;  %v45_v20 = vmul.f32 %v71_v18, %v21_v0 }
  0x34   :  { %v46_v21 = vmul.f32 %v73_v19, %v22_v1 }
  0x35   :  { %47 = vst [vmem:[#allocation5] sm:$0xff] %v45_v20 }
  0x36   :  { %48 = vst [vmem:[#allocation5 + $0x8] sm:$0xff] %v46_v21 }
  0x37   :  { %107 = shalt.err (!%p104_p12)
}
  0x38   :  { %s108_s22 = scalar_lea.hbm %s159_s1, 256 }
  0x39   :  { %p109_p13 = scmp.ne.s32.totalorder %s159_s1, %s108_s22  ;;  %p112_p0 = scmp.lt.u32.totalorder %s108_s22, %s159_s1 }
  0x3b   :  { %p114_p1 = pnand %p112_p0, %p109_p13 }
  0x3d   :  { %117 = shalt.err (!%p114_p1)
}
  0x3e   :  { %58 = dma.vmem_to_hbm [thread:$0]  %s56_s18, 256, %s159_s1, [#allocation4]  }
  0x3f   :  { %120 = dma.done.wait [#allocation4], 256  }
  0x40   :  { %121 = vsyncadd [#allocation4], 4294967040 }
  0x41   :  { %62 = vsyncpa [#allocation3], 1 }
  0x42   :  { %63 = vsyncpa [#allocation4], 1 }

</bundles_post_ra>
